<compile_context>
chip_gen: v5e
topology: v5e:2x2
jax: 0.10.0
libtpu: 0.0.40
codegen_flags: <defaults>
</compile_context>

<pallas_src>
import jax
import jax.numpy as jnp
from jax.experimental import pallas as pl
from jax.experimental.pallas import tpu as pltpu

_LANE = 128
_SUBLANE = 8
_ROW_CAP = 4096                      # rows per tile ceiling (budget is byte-driven)
_HEADROOM_BYTES = 2 * 1024 * 1024    # compiler scratch / metadata slack


def _adaptor_kernel(x_ref, w_ref, b_ref, o_ref):
    # Fused: logits = x @ W + b, then numerically-stable softmax over last dim.
    logits = jnp.dot(x_ref[...], w_ref[...], preferred_element_type=jnp.float32)
    logits = logits + b_ref[...]          # b_ref is (1, Np): broadcasts over rows
    m = jnp.max(logits, axis=-1, keepdims=True)
    e = jnp.exp(logits - m)               # padded classes: exp(-inf) == 0 exactly
    denom = jnp.sum(e, axis=-1, keepdims=True)
    # Exact divide (not approx reciprocal): keeps row sums == 1 to f32 precision,
    # and the kernel is memory-bound so the divide is hidden anyway.
    o_ref[...] = (e / denom).astype(o_ref.dtype)


def _round_up(x, m):
    return (x + m - 1) // m * m


def _vmem_limit_bytes():
    # Per-generation scoped-VMEM budget: ~3/4 of physical VMEM, capped at 96 MiB
    # (v5e/v6e: 128 MiB physical -> 96 MiB; v7x: 64 MiB physical -> 48 MiB).
    try:
        phys = pltpu.get_tpu_info().vmem_capacity_bytes
    except Exception:
        phys = 64 * 1024 * 1024          # conservative (v7x-sized) fallback
    return min(phys * 3 // 4, 96 * 1024 * 1024)


def _pick_batch_tile(B, dim, n_class_p, vmem_limit):
    # Full working-set accounting:
    #   resident : W (x1, single-buffered) + b (x1)
    #   streamed : 2 * TB * dim * 4   (double-buffered x)
    #            + 2 * TB * n_class_p * 4 (double-buffered output)
    w_bytes = dim * n_class_p * 4
    b_bytes = n_class_p * 4
    avail = vmem_limit - w_bytes - b_bytes - _HEADROOM_BYTES
    per_row = 2 * 4 * (dim + n_class_p)
    tb = avail // per_row if avail > 0 else _SUBLANE
    tb = max(_SUBLANE, min(_ROW_CAP, tb))
    # Keep >= 2 grid steps for medium/large batches so both v7x TensorCores
    # (dimension_semantics=("parallel",)) get work.
    if B >= 2 * _SUBLANE:
        tb = min(tb, _round_up(pl.cdiv(B, 2), _SUBLANE))
    tb = min(tb, _round_up(B, _SUBLANE))
    return _round_up(tb, _SUBLANE)


@jax.jit
def text_classification_adaptor(x, w, b):
    """x: (B, dim) f32; w: (dim, n_class) f32; b: (1, n_class) f32 -> (B, n_class) f32."""
    B, dim = x.shape
    n_class = w.shape[1]
    n_class_p = _round_up(n_class, _LANE)

    vmem_limit = _vmem_limit_bytes()
    TB = _pick_batch_tile(B, dim, n_class_p, vmem_limit)
    grid_b = pl.cdiv(B, TB)   # ragged last block handled by Pallas (rows independent)

    # Only the (tiny) classifier params are padded; x is streamed unpadded.
    # Padded W columns are zero and the bias there is -inf so those classes get
    # exactly zero softmax mass.
    w_p = jnp.pad(w, ((0, 0), (0, n_class_p - n_class)))
    b_p = jnp.pad(b, ((0, 0), (0, n_class_p - n_class)), constant_values=-jnp.inf)

    cost = pl.CostEstimate(
        flops=2 * B * dim * n_class_p,
        transcendentals=B * n_class_p,
        bytes_accessed=4 * (B * dim + dim * n_class_p + n_class_p + B * n_class_p),
    )

    out = pl.pallas_call(
        _adaptor_kernel,
        out_shape=jax.ShapeDtypeStruct((B, n_class_p), jnp.float32),
        grid_spec=pltpu.PrefetchScalarGridSpec(
            num_scalar_prefetch=0,
            grid=(grid_b,),
            in_specs=[
                # streamed, double-buffered x tiles
                pl.BlockSpec((TB, dim), lambda i: (i, 0)),
                # resident weight / bias: constant index_map -> single buffer
                pl.BlockSpec((dim, n_class_p), lambda i: (0, 0),
                             pipeline_mode=pl.Buffered(1)),
                pl.BlockSpec((1, n_class_p), lambda i: (0, 0),
                             pipeline_mode=pl.Buffered(1)),
            ],
            out_specs=pl.BlockSpec((TB, n_class_p), lambda i: (i, 0)),
        ),
        compiler_params=pltpu.CompilerParams(
            dimension_semantics=("parallel",),   # independent batch tiles (megacore on v7x)
            vmem_limit_bytes=vmem_limit,
        ),
        cost_estimate=cost,
    )(x, w_p, b_p)

    return out[:, :n_class]
    # TODO(synk): for very large `dim` additionally block the contraction axis
    # (grid=(cdiv(B,TB), dim//TK) + f32 VMEM accumulator); unnecessary at these sizes.


def init_params(key, dim, n_class):
    # Deterministic init mimicking nn.Linear defaults: U(-1/sqrt(dim), 1/sqrt(dim)).
    kw, kb = jax.random.split(key)
    bound = 1.0 / jnp.sqrt(jnp.float32(dim))
    # PyTorch stores weight as (n_class, dim); we keep the transposed (dim, n_class)
    # layout so the kernel does x @ W directly on the MXU.
    w = jax.random.uniform(kw, (dim, n_class), jnp.float32, -bound, bound)
    b = jax.random.uniform(kb, (1, n_class), jnp.float32, -bound, bound)
    return w, b


def reference(x, w, b):
    logits = x @ w + b
    return jax.nn.softmax(logits, axis=-1)


if __name__ == "__main__":
    B, dim, n_class = 8, 32, 8
    key = jax.random.PRNGKey(0)
    kx, kp = jax.random.split(key)
    x = jax.random.normal(kx, (B, dim), jnp.float32)
    w, b = init_params(kp, dim, n_class)

    out = text_classification_adaptor(x, w, b)
    jax.block_until_ready(out)

    ref = reference(x, w, b)
    assert out.shape == (B, n_class)
    assert jnp.allclose(out, ref, atol=1e-4, rtol=1e-4)
    assert jnp.allclose(jnp.sum(out, axis=-1), 1.0, atol=1e-5)
    print("KERNEL_OK")
</pallas_src>

<mosaic_0001>
module attributes {stable_mosaic.version = 11 : i64} {
  func.func @_adaptor_kernel(%arg0: i32, %arg1: memref<8x32xf32, #tpu.memory_space<vmem>>, %arg2: memref<32x128xf32, #tpu.memory_space<vmem>>, %arg3: memref<1x128xf32, #tpu.memory_space<vmem>>, %arg4: memref<8x128xf32, #tpu.memory_space<vmem>>) attributes {dimension_semantics = [#tpu.dimension_semantics<parallel>], iteration_bounds = array<i64: 1>, scalar_prefetch = 0 : i64, scratch_operands = 0 : i64, tpu.core_type = #tpu.core_type<tc>, window_params = [{transform_indices = @transform_0, window_bounds = array<i64: 8, 32>}, {pipeline_mode = #tpu.pipeline_mode<synchronous>, transform_indices = @transform_1, window_bounds = array<i64: 32, 128>}, {pipeline_mode = #tpu.pipeline_mode<synchronous>, transform_indices = @transform_2, window_bounds = array<i64: 1, 128>}, {transform_indices = @transform_3, window_bounds = array<i64: 8, 128>}]} {
    %c0 = arith.constant 0 : index
    %c0_0 = arith.constant 0 : index
    %0 = vector.load %arg1[%c0, %c0_0] : memref<8x32xf32, #tpu.memory_space<vmem>>, vector<8x32xf32>
    %c0_1 = arith.constant 0 : index
    %c0_2 = arith.constant 0 : index
    %1 = vector.load %arg2[%c0_1, %c0_2] : memref<32x128xf32, #tpu.memory_space<vmem>>, vector<32x128xf32>
    %cst = arith.constant dense<0.000000e+00> : vector<8x128xf32>
    %2 = tpu.matmul %0, %1, %cst {dimension_numbers = #tpu.dot_dimension_numbers<[1], [0], [0], [1], [0, 0, 1, 1], [], []>} : vector<8x32xf32>, vector<32x128xf32>, vector<8x128xf32> -> vector<8x128xf32>
    %c0_3 = arith.constant 0 : index
    %c0_4 = arith.constant 0 : index
    %3 = vector.load %arg3[%c0_3, %c0_4] : memref<1x128xf32, #tpu.memory_space<vmem>>, vector<1x128xf32>
    %4 = vector.broadcast %3 : vector<1x128xf32> to vector<8x128xf32>
    %5 = arith.addf %2, %4 : vector<8x128xf32>
    %cst_5 = arith.constant dense<0xFF800000> : vector<8xf32>
    %6 = vector.multi_reduction <maximumf>, %5, %cst_5 [1] : vector<8x128xf32> to vector<8xf32>
    %7 = vector.shape_cast %6 : vector<8xf32> to vector<8x1xf32>
    %8 = vector.broadcast %7 : vector<8x1xf32> to vector<8x128xf32>
    %9 = arith.subf %5, %8 : vector<8x128xf32>
    %10 = math.exp %9 : vector<8x128xf32>
    %cst_6 = arith.constant dense<0.000000e+00> : vector<8xf32>
    %11 = vector.multi_reduction <add>, %10, %cst_6 [1] : vector<8x128xf32> to vector<8xf32>
    %12 = vector.shape_cast %11 : vector<8xf32> to vector<8x1xf32>
    %13 = vector.broadcast %12 : vector<8x1xf32> to vector<8x128xf32>
    %14 = arith.divf %10, %13 : vector<8x128xf32>
    %c0_7 = arith.constant 0 : index
    %c0_8 = arith.constant 0 : index
    %15 = vector.load %arg4[%c0_7, %c0_8] : memref<8x128xf32, #tpu.memory_space<vmem>>, vector<8x128xf32>
    tpu.vector_store %arg4[%c0_7, %c0_8], %14 {strides = array<i32>} : memref<8x128xf32, #tpu.memory_space<vmem>>, vector<8x128xf32>,
    return
  }
  func.func @transform_0(%arg0: i32) -> (i32, i32) {
    %c0_i32 = arith.constant 0 : i32
    %c0_i32_0 = arith.constant 0 : i32
    return %arg0, %c0_i32 : i32, i32
  }
  func.func @transform_1(%arg0: i32) -> (i32, i32) {
    %c0_i32 = arith.constant 0 : i32
    %c0_i32_0 = arith.constant 0 : i32
    %c0_i32_1 = arith.constant 0 : i32
    return %c0_i32, %c0_i32_0 : i32, i32
  }
  func.func @transform_2(%arg0: i32) -> (i32, i32) {
    %c0_i32 = arith.constant 0 : i32
    %c0_i32_0 = arith.constant 0 : i32
    %c0_i32_1 = arith.constant 0 : i32
    return %c0_i32, %c0_i32_0 : i32, i32
  }
  func.func @transform_3(%arg0: i32) -> (i32, i32) {
    %c0_i32 = arith.constant 0 : i32
    %c0_i32_0 = arith.constant 0 : i32
    return %arg0, %c0_i32 : i32, i32
  }
}

</mosaic_0001>

<bundles_post_ra>
// kernel: text_classification_adaptor.1
= control target key start
LH: loop header
LB: loop body
LE: loop exit
PB: predicated region body
PF: predicated region fallthrough
CT: control target
= control target key end

     0   :  { %s162_s0 = inlined_call_operand.vmem [shape: f32[8,32], index: 0, kind: input, shape index: {}]   ;;  %s163_s1 = inlined_call_operand.vmem [shape: f32[32,128], index: 1, kind: input, shape index: {}]   ;;  %s164_s2 = inlined_call_operand.vmem [shape: f32[1,128], index: 2, kind: input, shape index: {}]   ;;  %s165_s3 = inlined_call_operand.hbm [shape: f32[8,128], index: 3, kind: output, shape index: {}]  }
   0x1   :  { %v19_v0 = vld [vmem:[%s163_s1 + $0x18] sm:$0xff]  ;;  %v18_v1 = vld [vmem:[%s163_s1 + $0x10] sm:$0xff]  ;;  %v17_v2 = vld [vmem:[%s163_s1 + $0x8] sm:$0xff] }
   0x2   :  { %40 = vmatpush.msra.mxu0 %v19_v0 }
   0x3   :  { %8 = vsyncpa [#allocation3], 0  ;;  %v16_v3 = vld [vmem:[%s163_s1] sm:$0xff]  ;;  %vm24_vm0 = vcmask 261120   ;;  %s78_s25 = sshll.u32 %s165_s3, 4  ;;  %s79_s25 = int_to_ptr.hbm [resolvable:$true] %s78_s25 }
   0x4   :  { %41 = vmatpush.msra.mxu0 %v18_v1  ;;  %v15_v4 = vld [vmem:[%s162_s0] sm:$0xff]  ;;  %s120_s0 = smov [#allocation2]  }
   0x5   :  { %v89_v5 = vld [vmem:[%s164_s2] ss:$0 sm:$0xff]  ;;  %s76_s1 = sshll.u32 %s120_s0, 4  ;;  %s77_s1 = int_to_ptr.vmem [resolvable:$true] %s76_s1 }
   0x6   :  { %42 = vmatpush.msra.mxu0 %v17_v2 }
   0x8   :  { %43 = vmatpush.msra.mxu0 %v16_v3 }
   0x9   :  { %87 = vmatmul.msk.f32.vlgmr.msra.gmra.mxu0 %vm24_vm0, %v15_v4 }
  0x86   :  { %v45_v6 = vpop.f32.mrf.mxu0 }
  0x87   :  { %v46_v7 = vadd.f32 %v89_v5, %v45_v6 }
  0x89   :  { %48 = vmax.xlane.f32.xlu0 %v46_v7 }
  0xfc   :  { %v49_v8 = vpop.xlane.xlu0 %48 }
  0xfd   :  { %v50_v9 = vsub.f32 %v46_v7, %v49_v8 }
  0xff   :  { %v51_v10 = vmul.f32 1.442695, %v50_v9 }
 0x101   :  { %90 = vpow2.f32 %v51_v10 }
 0x107   :  { %v91_v11 = vpop.eup %90 }
 0x108   :  { %53 = vadd.xlane.f32.xlu0 %v91_v11 }
 0x17b   :  { %v54_v12 = vpop.xlane.xlu0 %53 }
 0x17c   :  { %92 = vrcp.f32 %v54_v12  ;;  %v66_v16 = vand.u32 2147483648, %v54_v12  ;;  %v64_v18 = vand.u32 2147483647, %v54_v12  ;;  %vm60_vm2 = vweird.f32 %v54_v12 }
 0x17e   :  { %v67_v20 = vor.u32 1.1754944e-38, %v66_v16  ;;  %vm65_vm4 = vcmp.eq.f32.partialorder %v64_v18, 8.507059e+37 }
 0x182   :  { %v93_v13 = vpop.eup %92 }
 0x183   :  { %v56_v14 = vmul.f32 %v93_v13, %v54_v12  ;;  %vm61_vm1 = vweird.f32 %v93_v13 }
 0x184   :  { %vm62_vm3 = vmor %vm60_vm2, %vm61_vm1 }
 0x185   :  { %v57_v15 = vsub.f32 1.0, %v56_v14 }
 0x187   :  { %v58_v17 = vmul.f32 %v93_v13, %v57_v15 }
 0x189   :  { %v59_v19 = vadd.f32 %v93_v13, %v58_v17 }
 0x18b   :  { %v63_v21 = vsel %vm62_vm3, %v93_v13, %v59_v19 }
 0x18c   :  { %v68_v22 = vsel %vm65_vm4, %v67_v20, %v63_v21 }
 0x18d   :  { %v69_v23 = vmul.f32 %v91_v11, %v68_v22 }
 0x18f   :  { %70 = vst [vmem:[#allocation2] sm:$0xff] %v69_v23 }
 0x190   :  { %81 = dma.vmem_to_hbm [thread:$0]  %s77_s1, 128, %s79_s25, [#allocation3]  }
 0x191   :  { %118 = dma.done.wait [#allocation3], 128  }
 0x192   :  { %119 = vsyncadd [#allocation3], 4294967168 }
 0x193   :  { %86 = vsyncpa [#allocation3], 1 }

</bundles_post_ra>
